<compile_context>
chip_gen: v5e
topology: v5e:2x2
jax: 0.10.0
libtpu: 0.0.40
codegen_flags: <defaults>
</compile_context>

<pallas_src>
import jax
import jax.numpy as jnp
from jax.experimental import pallas as pl
from jax.experimental.pallas import tpu as pltpu


def _same_pad(k):
    # PyTorch padding='same' (stride=1, dilation=1, odd k): left = (k-1)//2
    total = k - 1
    left = total // 2
    return left, total - left


def _round_up(n, m):
    return ((n + m - 1) // m) * m


def make_convblock(B, C_in, dim, dim_out, L, k):
    left1, _ = _same_pad(k)
    left2, _ = _same_pad(k)
    shift = left1 + left2                    # left margin baked into the x layout

    halo = _round_up(k - 1, 128) if k > 1 else 0
    Wout = _round_up(L, 128)                 # lane-dense output tile width (per batch)
    Wh = Wout + halo                         # conv1 (halo'd) output tile width
    Wx = Wh + halo                           # conv1 (halo'd) input tile width

    def kernel(x_ref, w1_ref, b1_ref, w2_ref, b2_ref, o_ref):
        # x_ref : (C_in, Wx)       one zero-margined batch segment
        # w1_ref: (k, dim, C_in)   per-tap conv1 weights
        # b1_ref: (dim, 1)
        # w2_ref: (k, dim_out, dim)
        # b2_ref: (dim_out, 1)
        # o_ref : (dim_out, Wout)  lane-dense output tile
        x = x_ref[...]

        # ---- conv1 ('same') + ReLU, computed over the halo'd tile ----
        acc1 = jnp.zeros((dim, Wh), jnp.float32)
        for t in range(k):                       # tiny static unroll over taps
            acc1 = acc1 + jnp.dot(w1_ref[t], x[:, t:t + Wh],
                                  preferred_element_type=jnp.float32)
        h = jnp.maximum(acc1 + b1_ref[...], 0.0)

        # Zero the halo / padding columns so they act as conv2's 'same' zeros.
        lane = jax.lax.broadcasted_iota(jnp.int32, (dim, Wh), 1)
        h = jnp.where((lane >= left2) & (lane < left2 + L), h, 0.0)

        # ---- conv2 ('same') + ReLU over the lane-dense output tile ----
        acc2 = jnp.zeros((dim_out, Wout), jnp.float32)
        for t in range(k):
            acc2 = acc2 + jnp.dot(w2_ref[t], h[:, t:t + Wout],
                                  preferred_element_type=jnp.float32)
        o_ref[...] = jnp.maximum(acc2 + b2_ref[...], 0.0).astype(o_ref.dtype)

    grid = (B,)
    in_specs = [
        pl.BlockSpec((C_in, Wx), lambda i: (0, i)),             # x segments (pipelined)
        pl.BlockSpec((k, dim, C_in), lambda i: (0, 0, 0)),      # w1 (resident)
        pl.BlockSpec((dim, 1), lambda i: (0, 0)),               # b1
        pl.BlockSpec((k, dim_out, dim), lambda i: (0, 0, 0)),   # w2
        pl.BlockSpec((dim_out, 1), lambda i: (0, 0)),           # b2
    ]
    out_specs = pl.BlockSpec((dim_out, Wout), lambda i: (0, i))

    call = pl.pallas_call(
        kernel,
        grid=grid,
        in_specs=in_specs,
        out_specs=out_specs,
        out_shape=jax.ShapeDtypeStruct((dim_out, B * Wout), jnp.float32),
        compiler_params=pltpu.CompilerParams(
            dimension_semantics=("parallel",),      # v7x: shard batch over both TCs
            vmem_limit_bytes=32 * 1024 * 1024,      # safe on v5e/v6e/v7x
        ),
    )

    # TODO(synk): for very long sequences add a second grid axis over L-chunks
    # with k-1 halos (wrapper-side halo duplication or pl.Element index maps).

    @jax.jit
    def conv_block(x, w1, b1, w2, b2):
        # ---- plain-JAX glue: lane-dense layout + per-tap weight layout ----
        # x: (B, C_in, L) -> (C_in, B*Wx), each batch segment zero-margined so
        # column m of segment b holds x[b, :, m - shift] (zeros elsewhere).
        xt = jnp.transpose(x, (1, 0, 2))                          # (C_in, B, L)
        xt = jnp.pad(xt, ((0, 0), (0, 0), (shift, Wx - L - shift)))
        xf = xt.reshape(C_in, B * Wx)
        w1_t = jnp.transpose(w1, (2, 0, 1))                       # (k, dim, C_in)
        w2_t = jnp.transpose(w2, (2, 0, 1))                       # (k, dim_out, dim)
        y = call(xf, w1_t, b1.reshape(dim, 1), w2_t, b2.reshape(dim_out, 1))
        y = y.reshape(dim_out, B, Wout)[:, :, :L]                 # drop pad lanes
        return jnp.transpose(y, (1, 0, 2))                        # (B, dim_out, L)

    return conv_block


# ----------------------------- reference (pure JAX) -----------------------------
def _ref_conv1d_same(x, w, b, k):
    left, right = _same_pad(k)
    xp = jnp.pad(x, ((0, 0), (0, 0), (left, right)))
    y = jax.lax.conv_general_dilated(
        xp, w, window_strides=(1,), padding="VALID",
        dimension_numbers=("NCH", "OIH", "NCH"))
    return y + b[None, :, None]


def _ref_convblock(x, w1, b1, w2, b2, k):
    h = jnp.maximum(_ref_conv1d_same(x, w1, b1, k), 0.0)
    return jnp.maximum(_ref_conv1d_same(h, w2, b2, k), 0.0)


if __name__ == "__main__":
    # ConvBlock(kernel_size=3, dim_in=4, dim=8, dim_out=6), seq length 16, batch 2
    B, C_in, dim, dim_out, L, k = 2, 4, 8, 6, 16, 3

    key = jax.random.PRNGKey(0)
    kx, k1, k2, k3, k4 = jax.random.split(key, 5)
    x = jax.random.normal(kx, (B, C_in, L), dtype=jnp.float32)
    w1 = jax.random.normal(k1, (dim, C_in, k), dtype=jnp.float32) * 0.1
    b1 = jax.random.normal(k2, (dim,), dtype=jnp.float32) * 0.1
    w2 = jax.random.normal(k3, (dim_out, dim, k), dtype=jnp.float32) * 0.1
    b2 = jax.random.normal(k4, (dim_out,), dtype=jnp.float32) * 0.1

    conv_block = make_convblock(B, C_in, dim, dim_out, L, k)
    out = jax.block_until_ready(conv_block(x, w1, b1, w2, b2))

    ref = _ref_convblock(x, w1, b1, w2, b2, k)
    if not jnp.allclose(out, ref, atol=1e-5, rtol=1e-5):
        raise AssertionError("Pallas ConvBlock does not match reference")

    print("KERNEL_OK")
</pallas_src>

<mosaic_0001>
module attributes {stable_mosaic.version = 11 : i64} {
  func.func @kernel(%arg0: i32, %arg1: memref<4x384xf32, #tpu.memory_space<vmem>>, %arg2: memref<3x8x4xf32, #tpu.memory_space<vmem>>, %arg3: memref<8x1xf32, #tpu.memory_space<vmem>>, %arg4: memref<3x6x8xf32, #tpu.memory_space<vmem>>, %arg5: memref<6x1xf32, #tpu.memory_space<vmem>>, %arg6: memref<6x128xf32, #tpu.memory_space<vmem>>) attributes {dimension_semantics = [#tpu.dimension_semantics<parallel>], iteration_bounds = array<i64: 2>, scalar_prefetch = 0 : i64, scratch_operands = 0 : i64, tpu.core_type = #tpu.core_type<tc>, window_params = [{transform_indices = @transform_0, window_bounds = array<i64: 4, 384>}, {pipeline_mode = #tpu.pipeline_mode<synchronous>, transform_indices = @transform_1, window_bounds = array<i64: 3, 8, 4>}, {pipeline_mode = #tpu.pipeline_mode<synchronous>, transform_indices = @transform_2, window_bounds = array<i64: 8, 1>}, {pipeline_mode = #tpu.pipeline_mode<synchronous>, transform_indices = @transform_3, window_bounds = array<i64: 3, 6, 8>}, {pipeline_mode = #tpu.pipeline_mode<synchronous>, transform_indices = @transform_4, window_bounds = array<i64: 6, 1>}, {transform_indices = @transform_5, window_bounds = array<i64: 6, 128>}]} {
    %c0 = arith.constant 0 : index
    %c0_0 = arith.constant 0 : index
    %0 = vector.load %arg1[%c0, %c0_0] : memref<4x384xf32, #tpu.memory_space<vmem>>, vector<4x384xf32>
    %cst = arith.constant 0.000000e+00 : f32
    %1 = vector.broadcast %cst : f32 to vector<8x256xf32>
    %c0_1 = arith.constant 0 : index
    %c0_2 = arith.constant 0 : index
    %c0_3 = arith.constant 0 : index
    %2 = vector.load %arg2[%c0_1, %c0_2, %c0_3] : memref<3x8x4xf32, #tpu.memory_space<vmem>>, vector<1x8x4xf32>
    %3 = vector.shape_cast %2 : vector<1x8x4xf32> to vector<8x4xf32>
    %4 = vector.extract_strided_slice %0 {offsets = [0, 0], sizes = [4, 256], strides = [1, 1]} : vector<4x384xf32> to vector<4x256xf32>
    %cst_4 = arith.constant dense<0.000000e+00> : vector<8x256xf32>
    %5 = tpu.matmul %3, %4, %cst_4 {dimension_numbers = #tpu.dot_dimension_numbers<[1], [0], [0], [1], [0, 0, 1, 1], [], []>} : vector<8x4xf32>, vector<4x256xf32>, vector<8x256xf32> -> vector<8x256xf32>
    %6 = arith.addf %1, %5 : vector<8x256xf32>
    %c1 = arith.constant 1 : index
    %c0_5 = arith.constant 0 : index
    %c0_6 = arith.constant 0 : index
    %7 = vector.load %arg2[%c1, %c0_5, %c0_6] : memref<3x8x4xf32, #tpu.memory_space<vmem>>, vector<1x8x4xf32>
    %8 = vector.shape_cast %7 : vector<1x8x4xf32> to vector<8x4xf32>
    %9 = vector.extract_strided_slice %0 {offsets = [0, 1], sizes = [4, 256], strides = [1, 1]} : vector<4x384xf32> to vector<4x256xf32>
    %cst_7 = arith.constant dense<0.000000e+00> : vector<8x256xf32>
    %10 = tpu.matmul %8, %9, %cst_7 {dimension_numbers = #tpu.dot_dimension_numbers<[1], [0], [0], [1], [0, 0, 1, 1], [], []>} : vector<8x4xf32>, vector<4x256xf32>, vector<8x256xf32> -> vector<8x256xf32>
    %11 = arith.addf %6, %10 : vector<8x256xf32>
    %c2 = arith.constant 2 : index
    %c0_8 = arith.constant 0 : index
    %c0_9 = arith.constant 0 : index
    %12 = vector.load %arg2[%c2, %c0_8, %c0_9] : memref<3x8x4xf32, #tpu.memory_space<vmem>>, vector<1x8x4xf32>
    %13 = vector.shape_cast %12 : vector<1x8x4xf32> to vector<8x4xf32>
    %14 = vector.extract_strided_slice %0 {offsets = [0, 2], sizes = [4, 256], strides = [1, 1]} : vector<4x384xf32> to vector<4x256xf32>
    %cst_10 = arith.constant dense<0.000000e+00> : vector<8x256xf32>
    %15 = tpu.matmul %13, %14, %cst_10 {dimension_numbers = #tpu.dot_dimension_numbers<[1], [0], [0], [1], [0, 0, 1, 1], [], []>} : vector<8x4xf32>, vector<4x256xf32>, vector<8x256xf32> -> vector<8x256xf32>
    %16 = arith.addf %11, %15 : vector<8x256xf32>
    %c0_11 = arith.constant 0 : index
    %c0_12 = arith.constant 0 : index
    %17 = vector.load %arg3[%c0_11, %c0_12] : memref<8x1xf32, #tpu.memory_space<vmem>>, vector<8x1xf32>
    %18 = vector.broadcast %17 : vector<8x1xf32> to vector<8x256xf32>
    %19 = arith.addf %16, %18 : vector<8x256xf32>
    %cst_13 = arith.constant 0.000000e+00 : f32
    %20 = vector.broadcast %cst_13 : f32 to vector<8x256xf32>
    %21 = arith.maximumf %19, %20 : vector<8x256xf32>
    %22 = tpu.iota {dimensions = array<i32: 1>} : vector<8x256xi32>
    %c1_i32 = arith.constant 1 : i32
    %23 = vector.broadcast %c1_i32 : i32 to vector<8x256xi32>
    %24 = arith.cmpi sge, %22, %23 : vector<8x256xi32>
    %c17_i32 = arith.constant 17 : i32
    %25 = vector.broadcast %c17_i32 : i32 to vector<8x256xi32>
    %26 = arith.cmpi slt, %22, %25 : vector<8x256xi32>
    %27 = arith.andi %24, %26 : vector<8x256xi1>
    %cst_14 = arith.constant 0.000000e+00 : f32
    %28 = vector.broadcast %cst_14 : f32 to vector<8x256xf32>
    %29 = arith.select %27, %21, %28 : vector<8x256xi1>, vector<8x256xf32>
    %cst_15 = arith.constant 0.000000e+00 : f32
    %30 = vector.broadcast %cst_15 : f32 to vector<6x128xf32>
    %c0_16 = arith.constant 0 : index
    %c0_17 = arith.constant 0 : index
    %c0_18 = arith.constant 0 : index
    %31 = vector.load %arg4[%c0_16, %c0_17, %c0_18] : memref<3x6x8xf32, #tpu.memory_space<vmem>>, vector<1x6x8xf32>
    %32 = vector.shape_cast %31 : vector<1x6x8xf32> to vector<6x8xf32>
    %33 = vector.extract_strided_slice %29 {offsets = [0, 0], sizes = [8, 128], strides = [1, 1]} : vector<8x256xf32> to vector<8x128xf32>
    %cst_19 = arith.constant dense<0.000000e+00> : vector<6x128xf32>
    %34 = tpu.matmul %32, %33, %cst_19 {dimension_numbers = #tpu.dot_dimension_numbers<[1], [0], [0], [1], [0, 0, 1, 1], [], []>} : vector<6x8xf32>, vector<8x128xf32>, vector<6x128xf32> -> vector<6x128xf32>
    %35 = arith.addf %30, %34 : vector<6x128xf32>
    %c1_20 = arith.constant 1 : index
    %c0_21 = arith.constant 0 : index
    %c0_22 = arith.constant 0 : index
    %36 = vector.load %arg4[%c1_20, %c0_21, %c0_22] : memref<3x6x8xf32, #tpu.memory_space<vmem>>, vector<1x6x8xf32>
    %37 = vector.shape_cast %36 : vector<1x6x8xf32> to vector<6x8xf32>
    %38 = vector.extract_strided_slice %29 {offsets = [0, 1], sizes = [8, 128], strides = [1, 1]} : vector<8x256xf32> to vector<8x128xf32>
    %cst_23 = arith.constant dense<0.000000e+00> : vector<6x128xf32>
    %39 = tpu.matmul %37, %38, %cst_23 {dimension_numbers = #tpu.dot_dimension_numbers<[1], [0], [0], [1], [0, 0, 1, 1], [], []>} : vector<6x8xf32>, vector<8x128xf32>, vector<6x128xf32> -> vector<6x128xf32>
    %40 = arith.addf %35, %39 : vector<6x128xf32>
    %c2_24 = arith.constant 2 : index
    %c0_25 = arith.constant 0 : index
    %c0_26 = arith.constant 0 : index
    %41 = vector.load %arg4[%c2_24, %c0_25, %c0_26] : memref<3x6x8xf32, #tpu.memory_space<vmem>>, vector<1x6x8xf32>
    %42 = vector.shape_cast %41 : vector<1x6x8xf32> to vector<6x8xf32>
    %43 = vector.extract_strided_slice %29 {offsets = [0, 2], sizes = [8, 128], strides = [1, 1]} : vector<8x256xf32> to vector<8x128xf32>
    %cst_27 = arith.constant dense<0.000000e+00> : vector<6x128xf32>
    %44 = tpu.matmul %42, %43, %cst_27 {dimension_numbers = #tpu.dot_dimension_numbers<[1], [0], [0], [1], [0, 0, 1, 1], [], []>} : vector<6x8xf32>, vector<8x128xf32>, vector<6x128xf32> -> vector<6x128xf32>
    %45 = arith.addf %40, %44 : vector<6x128xf32>
    %c0_28 = arith.constant 0 : index
    %c0_29 = arith.constant 0 : index
    %46 = vector.load %arg5[%c0_28, %c0_29] : memref<6x1xf32, #tpu.memory_space<vmem>>, vector<6x1xf32>
    %47 = vector.broadcast %46 : vector<6x1xf32> to vector<6x128xf32>
    %48 = arith.addf %45, %47 : vector<6x128xf32>
    %cst_30 = arith.constant 0.000000e+00 : f32
    %49 = vector.broadcast %cst_30 : f32 to vector<6x128xf32>
    %50 = arith.maximumf %48, %49 : vector<6x128xf32>
    %c0_31 = arith.constant 0 : index
    %c0_32 = arith.constant 0 : index
    %51 = vector.load %arg6[%c0_31, %c0_32] : memref<6x128xf32, #tpu.memory_space<vmem>>, vector<6x128xf32>
    tpu.vector_store %arg6[%c0_31, %c0_32], %50 {strides = array<i32>} : memref<6x128xf32, #tpu.memory_space<vmem>>, vector<6x128xf32>,
    return
  }
  func.func @transform_0(%arg0: i32) -> (i32, i32) {
    %c0_i32 = arith.constant 0 : i32
    %c0_i32_0 = arith.constant 0 : i32
    return %c0_i32, %arg0 : i32, i32
  }
  func.func @transform_1(%arg0: i32) -> (i32, i32, i32) {
    %c0_i32 = arith.constant 0 : i32
    %c0_i32_0 = arith.constant 0 : i32
    %c0_i32_1 = arith.constant 0 : i32
    %c0_i32_2 = arith.constant 0 : i32
    return %c0_i32, %c0_i32_0, %c0_i32_1 : i32, i32, i32
  }
  func.func @transform_2(%arg0: i32) -> (i32, i32) {
    %c0_i32 = arith.constant 0 : i32
    %c0_i32_0 = arith.constant 0 : i32
    %c0_i32_1 = arith.constant 0 : i32
    return %c0_i32, %c0_i32_0 : i32, i32
  }
  func.func @transform_3(%arg0: i32) -> (i32, i32, i32) {
    %c0_i32 = arith.constant 0 : i32
    %c0_i32_0 = arith.constant 0 : i32
    %c0_i32_1 = arith.constant 0 : i32
    %c0_i32_2 = arith.constant 0 : i32
    return %c0_i32, %c0_i32_0, %c0_i32_1 : i32, i32, i32
  }
  func.func @transform_4(%arg0: i32) -> (i32, i32) {
    %c0_i32 = arith.constant 0 : i32
    %c0_i32_0 = arith.constant 0 : i32
    %c0_i32_1 = arith.constant 0 : i32
    return %c0_i32, %c0_i32_0 : i32, i32
  }
  func.func @transform_5(%arg0: i32) -> (i32, i32) {
    %c0_i32 = arith.constant 0 : i32
    %c0_i32_0 = arith.constant 0 : i32
    return %c0_i32, %arg0 : i32, i32
  }
}

</mosaic_0001>

<bundles_post_ra>
// kernel: conv_block.1
= control target key start
LH: loop header
LB: loop body
LE: loop exit
PB: predicated region body
PF: predicated region fallthrough
CT: control target
= control target key end

     0   :  { %s679_s18 = smov 0   ;;  %s754_s0 = inlined_call_operand.vmem [shape: f32[4,768], index: 0, kind: input, shape index: {}]   ;;  %s755_s1 = inlined_call_operand.vmem [shape: f32[3,8,4], index: 1, kind: input, shape index: {}]   ;;  %s756_s2 = inlined_call_operand.vmem [shape: f32[8,1], index: 2, kind: input, shape index: {}]   ;;  %s757_s3 = inlined_call_operand.vmem [shape: f32[3,6,8], index: 3, kind: input, shape index: {}]   ;;  %s758_s4 = inlined_call_operand.vmem [shape: f32[6,1], index: 4, kind: input, shape index: {}]   ;;  %s759_s5 = inlined_call_operand.vmem [shape: f32[6,256], index: 5, kind: output, shape index: {}]  }
   0x1 LB: > { %s685_s19 = sadd.s32 4294967295, %s644_s18   ;;  %p589_p0 = scmp.ge.s32.totalorder %s644_s18, 1  ;;  %s644_s18 = sphi %s679_s18, %s15_s18  }
   0x2   : > { %p188_p1 = scmp.lt.s32.totalorder %s644_s18, 3 }
   0x4   : > { %p189_p2 = pnand %p589_p0, %p188_p1 }
   0x5   : > { %s215_s20 = smul.u32 (!%p189_p2), 3, %s685_s19  ;;  %s646_s25 = smov (!%p189_p2), 127  }
   0x6   : > { %192 = sbr.rel (%p189_p2) target bundleno = 551 (0x227), region = 40  ;;  %s647_s26 = smov (!%p189_p2), 126  }
   0x7   : > { %p216_p3 = scmp.lt.s32.totalorder (!%p189_p2), %s215_s20, 5  ;;  %p221_p4 = scmp.lt.s32.totalorder (!%p189_p2), %s685_s19, 1 }
   0xb   : > { %s761_s20 = smov (!%p216_p3, %s215_s20), 5  ;;  %vm251_vm0 = vcmask 1043456   ;;  %v227_v9 = vld [vmem:[%s755_s1] sm:$0xff]  ;;  %vm247_vm1 = vcmask 31744   ;;  %v648_v11 = vmov 0   ;;  %vm244_vm2 = vcmask 1039360  }
   0xc   : > { %s590_s21 = sshll.u32 %s761_s20, 2  ;;  %v412_v10 = vld [vmem:[%s756_s2] sm:$0xff]  ;;  %626 = vset.pattern.permute.xlu2 %v648_v11  ;;  %637 = vset.pattern.permute.xlu0 %v648_v11  ;;  %v592_v14 = vld [vmem:[%s755_s1 + $0x8] sm:$0xff]  ;;  %vm360_vm3 = vcmask 1031168   ;;  %v601_v20 = vld [vmem:[%s755_s1 + $0x10] sm:$0xff]  ;;  %v422_v25 = vlaneseq  ;;  %vm444_vm7 = vcmask 64512  }
   0xd   : > { %s219_s24 = scalar_lea.vmem %s754_s0, %s590_s21  ;;  %415 = vperm.xlu2 %626, %v412_v10   ;;  %v433_v37 = vld [vmem:[%s757_s3] sm:$0x3f]  ;;  %v606_v42 = vld [vmem:[%s757_s3 + $0x8] sm:$0x3f]  ;;  %v610_v49 = vld [vmem:[%s757_s3 + $0x10] sm:$0x3f] }
   0xe   : > { %v225_v0 = vld [vmem:[%s219_s24] sm:$0xff]  ;;  %v226_v1 = vld [vmem:[%s219_s24 + $0x8] sm:$0xf]  ;;  %v423_v27 = vand.u32 127, %v422_v25  ;;  %s763_s19 = smov (!%p221_p4, %s685_s19), 1 }
   0xf   : > { %232 = vst [vmem:[#allocation1] ss:$2 sm:$0xff] %v225_v0  ;;  %v523_v38 = vld [vmem:[%s758_s4] sm:$0x3f]  ;;  %s591_s20 = sshll.u32 %s763_s19, 3 }
  0x10   : > { %234 = vst [vmem:[#allocation1 + $0x10] ss:$2 sm:$0xff] %v226_v1  ;;  %vm425_vm4 = vcmp.ge.s32.totalorder %v423_v27, 1  ;;  %vm427_vm5 = vcmp.lt.s32.totalorder %v423_v27, 17  ;;  %s224_s23 = scalar_lea.vmem %s759_s5, %s591_s20 }
  0x11   : > { %vm429_vm6 = vmand %vm425_vm4, %vm427_vm5 }
  0x16   : > { %v235_v2 = vld.sshfl [vmem:[#allocation1] sm:$0xff pattern:$0x75316420]  ;;  %v236_v3 = vld.sshfl [vmem:[#allocation1 + $0x8] sm:$0xff pattern:$0x75316420] }
  0x17   : > { %238 = vrot.lane.b32.xlu0 %v235_v2, %s646_s25  ;;  %296 = vst [vmem:[#allocation1] ss:$2 sm:$0xff] %v225_v0  ;;  %v237_v4 = vld.sshfl [vmem:[#allocation1 + $0x10] sm:$0xff pattern:$0x75316420] }
  0x18   : > { %350 = vst [vmem:[#allocation1 + $0x10] ss:$2 sm:$0xff] %v226_v1 }
  0x1e   : > { %v297_v5 = vld.sshfl [vmem:[#allocation1] sm:$0xff pattern:$0x75316420]  ;;  %v298_v6 = vld.sshfl [vmem:[#allocation1 + $0x8] sm:$0xff pattern:$0x75316420] }
  0x1f   : > { %240 = vrot.lane.b32.xlu0 %v236_v3, %s646_s25  ;;  %348 = vst [vmem:[#allocation1] ss:$2 sm:$0xff] %v225_v0  ;;  %597 = vmatpush.msk.msra.mxu2 %vm251_vm0, %v297_v5  ;;  %v353_v36 = vld.sshfl [vmem:[#allocation1 + $0x10] sm:$0xff pattern:$0x75316420] }
  0x20   : > { %599 = vmatpush.msk.msra.mxu3 %vm251_vm0, %v298_v6  ;;  %598 = vmatmul.msk.f32.vlgmr.msra.gmra.mxu2 %vm247_vm1, %v227_v9 }
  0x21   : > { %600 = vmatmul.msk.f32.vlgmr.msra.gmra.mxu3 %vm247_vm1, %v227_v9 }
  0x26   : > { %v351_v7 = vld.sshfl [vmem:[#allocation1] sm:$0xff pattern:$0x75316420]  ;;  %v352_v8 = vld.sshfl [vmem:[#allocation1 + $0x8] sm:$0xff pattern:$0x75316420] }
  0x27   : > { %242 = vrot.lane.b32.xlu0 %v237_v4, %s646_s25  ;;  %354 = vrot.lane.b32.xlu1 %v351_v7, %s647_s26 }
  0x2f   : > { %356 = vrot.lane.b32.xlu1 %v352_v8, %s647_s26  ;;  %526 = vperm.xlu0 %637, %v523_v38  }
  0x67   : > { %v416_v30 = vpop.permute.xlu2 %415 }
  0x89   : > { %v239_v12 = vpop.permute.xlu0 %238 }
  0x91   : > { %v241_v13 = vpop.permute.xlu0 %240 }
  0x92   : > { %v245_v15 = vsel %vm244_vm2, %v239_v12, %v241_v13 }
  0x93   : > { %593 = vmatpush.msk.msra.mxu0 %vm251_vm0, %v245_v15 }
  0x94   : > { %594 = vmatmul.msk.f32.vlgmr.msra.gmra.mxu0 %vm247_vm1, %v592_v14 }
  0x99   : > { %v243_v16 = vpop.permute.xlu0 %242  ;;  %v355_v17 = vpop.permute.xlu1 %354 }
  0x9a   : > { %v246_v18 = vsel %vm244_vm2, %v241_v13, %v243_v16 }
  0x9b   : > { %595 = vmatpush.msk.msra.mxu1 %vm251_vm0, %v246_v18 }
  0x9c   : > { %596 = vmatmul.msk.f32.vlgmr.msra.gmra.mxu1 %vm247_vm1, %v592_v14 }
  0xa1   : > { %v357_v19 = vpop.permute.xlu1 %356  ;;  %v527_v56 = vpop.permute.xlu0 %526 }
  0xa2   : > { %v361_v21 = vsel %vm360_vm3, %v355_v17, %v357_v19 }
  0xa3   : > { %602 = vmatpush.msk.msrb.mxu0 %vm251_vm0, %v361_v21  ;;  %v323_v26 = vpop.f32.mrf.mxu2 }
  0xa4   : > { %603 = vmatmul.msk.f32.vlgmr.msrb.gmra.mxu0 %vm247_vm1, %v601_v20  ;;  %v343_v22 = vpop.f32.mrf.mxu3 }
 0x111   : > { %v273_v23 = vpop.f32.mrf.mxu0 }
 0x112   : > { %v324_v28 = vadd.f32 %v323_v26, %v273_v23 }
 0x119   : > { %v293_v24 = vpop.f32.mrf.mxu1 }
 0x121   : > { %v387_v29 = vpop.f32.mrf.mxu0 }
 0x122   : > { %v410_v31 = vadd.f32 %v387_v29, %v324_v28 }
 0x124   : > { %v418_v32 = vadd.f32 %v416_v30, %v410_v31 }
 0x126   : > { %v420_v33 = vmax.f32 %v418_v32, 0.0 }
 0x128   : > { %v431_v34 = vsel %vm429_vm6, %v420_v33, 0.0  ;;  %608 = vmatpush.msk.msrb.mxu3 %vm429_vm6, %v420_v33 }
 0x129   : > { %v632_v35 = vpack.i.bf16 0.0, %v431_v34  ;;  %609 = vmatmul.msk.f32.vlgmr.msrb.gmra.mxu3 %vm444_vm7, %v433_v37 }
 0x12b   : > { %633 = vrot.lane.b32.xlu1 %v632_v35, %s647_s26  ;;  %628 = vrot.lane.b32.xlu2 %v632_v35, %s646_s25 }
 0x133   : > { %358 = vrot.lane.b32.xlu2 %v353_v36, %s647_s26 }
 0x185   : > { %v629_v39 = vpop.permute.xlu2 %628 }
 0x186   : > { %v631_v40 = vunpack.i.h.bf16 %v629_v39  ;;  %v630_v41 = vunpack.i.l.bf16 %v629_v39 }
 0x188   : > { %v442_v43 = vsel %vm244_vm2, %v630_v41, %v631_v40 }
 0x189   : > { %463 = vmatpush.msrb.mxu2 %v442_v43 }
 0x18a   : > { %607 = vmatmul.msk.f32.vlgmr.msrb.gmra.mxu2 %vm444_vm7, %v606_v42 }
 0x18d   : > { %v359_v44 = vpop.permute.xlu2 %358 }
 0x18e   : > { %v362_v45 = vsel %vm360_vm3, %v357_v19, %v359_v44 }
 0x18f   : > { %604 = vmatpush.msk.msrb.mxu1 %vm251_vm0, %v362_v45 }
 0x190   : > { %605 = vmatmul.msk.f32.vlgmr.msrb.gmra.mxu1 %vm247_vm1, %v601_v20 }
 0x19d   : > { %v634_v46 = vpop.permute.xlu1 %633 }
 0x19e   : > { %v636_v47 = vunpack.i.h.bf16 %v634_v46  ;;  %v635_v48 = vunpack.i.l.bf16 %v634_v46 }
 0x1a0   : > { %v497_v50 = vsel %vm360_vm3, %v635_v48, %v636_v47 }
 0x1a1   : > { %517 = vmatpush.msra.mxu0 %v497_v50 }
 0x1a2   : > { %611 = vmatmul.msk.f32.vlgmr.msra.gmra.mxu0 %vm444_vm7, %v610_v49 }
 0x1ac   : > { %v488_v53 = vpop.f32.mrf.mxu3 }
 0x20d   : > { %v407_v51 = vpop.f32.mrf.mxu1  ;;  %v465_v52 = vpop.f32.mrf.mxu2 }
 0x20e   : > { %v489_v54 = vadd.f32 %v488_v53, %v465_v52 }
 0x21f   : > { %v519_v55 = vpop.f32.mrf.mxu0 }
 0x220   : > { %v522_v57 = vadd.f32 %v519_v55, %v489_v54 }
 0x222   : > { %v529_v58 = vadd.f32 %v527_v56, %v522_v57 }
 0x224   : > { %v530_v59 = vmax.f32 %v529_v58, 0.0 }
 0x226   : > { %531 = vst [vmem:[%s224_s23] sm:$0x3f] %v530_v59 }
 0x227 PF: > { %s15_s18 = sadd.s32 1, %s644_s18  }
 0x228   : > { %p12_p5 = scmp.ge.s32.totalorder %s15_s18, 4  }
 0x22a   :  { %14 = sbr.rel (!%p12_p5) target bundleno = 1 (0x1), region = 76 }

</bundles_post_ra>
